<compile_context>
chip_gen: v6e
topology: v6e:2x2x1
jax: 0.10.0
libtpu: 0.0.40
codegen_flags: <defaults>
</compile_context>

<pallas_src>
import functools

import jax
import jax.numpy as jnp
from jax.experimental import pallas as pl
from jax.experimental.pallas import tpu as pltpu


def _tcl_kernel(*refs, dilation, has_res_conv):
    """Fused TemporalCausalLayer for one batch element.

    refs (has_res_conv=True):
        x_ref      (1, Cin,  L+P)   left-padded input
        w1_ref     (K, Cout, Cin)   conv1 effective weights (per-tap matrices)
        b1_ref     (Cout, 1)
        w2_ref     (K, Cout, Cout)  conv2 effective weights
        b2_ref     (Cout, 1)
        wb_ref     (Cout, Cin)      residual 1x1 conv weight
        bb_ref     (Cout, 1)
        o_ref      (1, Cout, L)
        y1pad_ref  (Cout, L+P)      VMEM scratch (left-padded conv1 output)
    """
    if has_res_conv:
        (x_ref, w1_ref, b1_ref, w2_ref, b2_ref,
         wb_ref, bb_ref, o_ref, y1pad_ref) = refs
    else:
        (x_ref, w1_ref, b1_ref, w2_ref, b2_ref,
         o_ref, y1pad_ref) = refs
        wb_ref = bb_ref = None

    c_out, l_out = o_ref.shape[1], o_ref.shape[2]
    pad = x_ref.shape[2] - l_out            # (K-1)*dilation
    k_taps = w1_ref.shape[0]

    x_p = x_ref[0].astype(jnp.float32)      # (Cin, L+P)

    # ---- conv1 (causal dilated conv; crop fused: only L outputs produced) ----
    acc1 = jnp.zeros((c_out, l_out), jnp.float32)
    for k in range(k_taps):
        off = k * dilation
        acc1 = acc1 + jnp.dot(w1_ref[k].astype(jnp.float32),
                              x_p[:, off:off + l_out],
                              preferred_element_type=jnp.float32)
    y1 = jnp.maximum(acc1 + b1_ref[...].astype(jnp.float32), 0.0)
    # dropout1: identity (eval mode)

    # Stage y1 left-padded with `pad` zeros so conv2 is causal as well.
    if pad > 0:
        y1pad_ref[:, :pad] = jnp.zeros((c_out, pad), jnp.float32)
    y1pad_ref[:, pad:] = y1

    # ---- conv2 ----
    acc2 = jnp.zeros((c_out, l_out), jnp.float32)
    for k in range(k_taps):
        off = k * dilation
        acc2 = acc2 + jnp.dot(w2_ref[k].astype(jnp.float32),
                              y1pad_ref[:, off:off + l_out],
                              preferred_element_type=jnp.float32)
    y2 = jnp.maximum(acc2 + b2_ref[...].astype(jnp.float32), 0.0)
    # dropout2: identity (eval mode)

    # ---- residual path + final ReLU ----
    x_crop = x_p[:, pad:]                    # the original (un-padded) input
    if has_res_conv:
        res = jnp.dot(wb_ref[...].astype(jnp.float32), x_crop,
                      preferred_element_type=jnp.float32)
        res = res + bb_ref[...].astype(jnp.float32)
    else:
        res = x_crop

    o_ref[0] = jnp.maximum(y2 + res, 0.0).astype(o_ref.dtype)


def weight_norm_effective(v, g):
    """torch.nn.utils.weight_norm (dim=0) effective weight: g * v / ||v||."""
    norm = jnp.sqrt(jnp.sum(v.astype(jnp.float32) ** 2, axis=(1, 2),
                            keepdims=True))
    return (g * v / norm).astype(v.dtype)


def temporal_causal_layer(x, w1, b1, w2, b2, wb, bb, *,
                          kernel_size, stride=1, dilation=1):
    """Forward of TemporalCasualLayer (eval mode).

    x  : (N, Cin, L)
    w1 : (Cout, Cin, K)   effective (weight-normed) conv1 weight
    w2 : (Cout, Cout, K)  effective (weight-normed) conv2 weight
    wb : (Cout, Cin) or None   residual 1x1 conv weight (None => identity)
    """
    assert stride == 1, "only stride=1 is supported (standard TCN usage)"
    n, c_in, l = x.shape
    c_out, _, k = w1.shape
    pad = (k - 1) * dilation
    assert w1.shape == (c_out, c_in, k)
    assert w2.shape == (c_out, c_out, k)

    # Left-pad once: causal conv + crop == conv over a left-padded input.
    x_pad = jnp.pad(x, ((0, 0), (0, 0), (pad, 0)))

    # (K, Cout, Cin) layout so w_ref[k] is a ready-to-matmul (Cout, Cin) tile.
    w1_k = jnp.transpose(w1, (2, 0, 1))
    w2_k = jnp.transpose(w2, (2, 0, 1))
    b1_c = b1.reshape(c_out, 1)
    b2_c = b2.reshape(c_out, 1)

    has_res_conv = wb is not None

    in_specs = [
        pl.BlockSpec((1, c_in, l + pad), lambda i: (i, 0, 0)),
        pl.BlockSpec((k, c_out, c_in), lambda i: (0, 0, 0)),
        pl.BlockSpec((c_out, 1), lambda i: (0, 0)),
        pl.BlockSpec((k, c_out, c_out), lambda i: (0, 0, 0)),
        pl.BlockSpec((c_out, 1), lambda i: (0, 0)),
    ]
    args = [x_pad, w1_k, b1_c, w2_k, b2_c]
    if has_res_conv:
        in_specs += [
            pl.BlockSpec((c_out, c_in), lambda i: (0, 0)),
            pl.BlockSpec((c_out, 1), lambda i: (0, 0)),
        ]
        args += [wb.reshape(c_out, c_in), bb.reshape(c_out, 1)]

    kernel = functools.partial(_tcl_kernel, dilation=dilation,
                               has_res_conv=has_res_conv)

    itemsize = jnp.dtype(x.dtype).itemsize
    flops = 2 * n * l * k * c_out * (c_in + c_out)
    if has_res_conv:
        flops += 2 * n * l * c_out * c_in
    cost = pl.CostEstimate(
        flops=flops,
        transcendentals=0,
        bytes_accessed=(x_pad.size + n * c_out * l) * itemsize,
    )

    return pl.pallas_call(
        kernel,
        out_shape=jax.ShapeDtypeStruct((n, c_out, l), x.dtype),
        grid_spec=pltpu.PrefetchScalarGridSpec(
            num_scalar_prefetch=0,
            grid=(n,),
            in_specs=in_specs,
            out_specs=pl.BlockSpec((1, c_out, l), lambda i: (i, 0, 0)),
            scratch_shapes=[pltpu.VMEM((c_out, l + pad), jnp.float32)],
        ),
        compiler_params=pltpu.CompilerParams(
            dimension_semantics=("parallel",),
        ),
        cost_estimate=cost,
    )(*args)


# ----------------------------- pure-JAX reference ----------------------------

def _ref_layer(x, w1, b1, w2, b2, wb, bb, *, dilation, padding):
    def causal_conv(inp, w, b):
        out = jax.lax.conv_general_dilated(
            inp, w,
            window_strides=(1,),
            padding=[(padding, padding)],
            rhs_dilation=(dilation,),
            dimension_numbers=("NCH", "OIH", "NCH"),
        )
        out = out[:, :, :inp.shape[2]]       # crop the last `padding` outputs
        return out + b[None, :, None]

    y = jnp.maximum(causal_conv(x, w1, b1), 0.0)
    y = jnp.maximum(causal_conv(y, w2, b2), 0.0)
    if wb is not None:
        res = jnp.einsum("oi,nil->nol", wb, x) + bb[None, :, None]
    else:
        res = x
    return jnp.maximum(y + res, 0.0)


if __name__ == "__main__":
    key = jax.random.PRNGKey(0)
    N, C_IN, C_OUT, L = 2, 4, 8, 16
    K, STRIDE, DILATION = 5, 1, 1
    PAD = (K - 1) * DILATION

    keys = jax.random.split(key, 12)
    x = jax.random.normal(keys[0], (N, C_IN, L), dtype=jnp.float32)

    # --- case A: n_inputs != n_outputs  (residual 1x1 conv path) ---
    v1 = jax.random.normal(keys[1], (C_OUT, C_IN, K), dtype=jnp.float32) * 0.3
    g1 = jax.random.normal(keys[2], (C_OUT, 1, 1), dtype=jnp.float32) * 0.3 + 1.0
    b1 = jax.random.normal(keys[3], (C_OUT,), dtype=jnp.float32) * 0.1
    v2 = jax.random.normal(keys[4], (C_OUT, C_OUT, K), dtype=jnp.float32) * 0.3
    g2 = jax.random.normal(keys[5], (C_OUT, 1, 1), dtype=jnp.float32) * 0.3 + 1.0
    b2 = jax.random.normal(keys[6], (C_OUT,), dtype=jnp.float32) * 0.1
    wb = jax.random.normal(keys[7], (C_OUT, C_IN), dtype=jnp.float32) * 0.3
    bb = jax.random.normal(keys[8], (C_OUT,), dtype=jnp.float32) * 0.1

    w1 = weight_norm_effective(v1, g1)
    w2 = weight_norm_effective(v2, g2)

    out_a = temporal_causal_layer(x, w1, b1, w2, b2, wb, bb,
                                  kernel_size=K, stride=STRIDE,
                                  dilation=DILATION)
    out_a = jax.block_until_ready(out_a)
    ref_a = _ref_layer(x, w1, b1, w2, b2, wb, bb,
                       dilation=DILATION, padding=PAD)
    assert out_a.shape == (N, C_OUT, L), out_a.shape
    assert out_a.dtype == x.dtype
    assert jnp.allclose(out_a, ref_a, atol=1e-4, rtol=1e-4), \
        float(jnp.max(jnp.abs(out_a - ref_a)))

    # --- case B: n_inputs == n_outputs  (identity residual path) ---
    x_b = jax.random.normal(keys[9], (N, C_OUT, L), dtype=jnp.float32)
    v1b = jax.random.normal(keys[10], (C_OUT, C_OUT, K), dtype=jnp.float32) * 0.3
    w1b = weight_norm_effective(v1b, g1)
    w2b = w2  # reuse
    out_b = temporal_causal_layer(x_b, w1b, b1, w2b, b2, None, None,
                                  kernel_size=K, stride=STRIDE,
                                  dilation=DILATION)
    out_b = jax.block_until_ready(out_b)
    ref_b = _ref_layer(x_b, w1b, b1, w2b, b2, None, None,
                       dilation=DILATION, padding=PAD)
    assert out_b.shape == (N, C_OUT, L), out_b.shape
    assert jnp.allclose(out_b, ref_b, atol=1e-4, rtol=1e-4), \
        float(jnp.max(jnp.abs(out_b - ref_b)))

    print("KERNEL_OK")
</pallas_src>

<mosaic_0001>
module attributes {stable_mosaic.version = 11 : i64} {
  func.func @_tcl_kernel(%arg0: i32, %arg1: memref<1x4x20xf32, #tpu.memory_space<vmem>>, %arg2: memref<5x8x4xf32, #tpu.memory_space<vmem>>, %arg3: memref<8x1xf32, #tpu.memory_space<vmem>>, %arg4: memref<5x8x8xf32, #tpu.memory_space<vmem>>, %arg5: memref<8x1xf32, #tpu.memory_space<vmem>>, %arg6: memref<8x4xf32, #tpu.memory_space<vmem>>, %arg7: memref<8x1xf32, #tpu.memory_space<vmem>>, %arg8: memref<1x8x16xf32, #tpu.memory_space<vmem>>, %arg9: memref<8x20xf32, #tpu.memory_space<vmem>>) attributes {dimension_semantics = [#tpu.dimension_semantics<parallel>], iteration_bounds = array<i64: 2>, scalar_prefetch = 0 : i64, scratch_operands = 1 : i64, tpu.core_type = #tpu.core_type<tc>, window_params = [{transform_indices = @transform_0, window_bounds = array<i64: 1, 4, 20>}, {pipeline_mode = #tpu.pipeline_mode<synchronous>, transform_indices = @transform_1, window_bounds = array<i64: 5, 8, 4>}, {pipeline_mode = #tpu.pipeline_mode<synchronous>, transform_indices = @transform_2, window_bounds = array<i64: 8, 1>}, {pipeline_mode = #tpu.pipeline_mode<synchronous>, transform_indices = @transform_3, window_bounds = array<i64: 5, 8, 8>}, {pipeline_mode = #tpu.pipeline_mode<synchronous>, transform_indices = @transform_4, window_bounds = array<i64: 8, 1>}, {pipeline_mode = #tpu.pipeline_mode<synchronous>, transform_indices = @transform_5, window_bounds = array<i64: 8, 4>}, {pipeline_mode = #tpu.pipeline_mode<synchronous>, transform_indices = @transform_6, window_bounds = array<i64: 8, 1>}, {transform_indices = @transform_7, window_bounds = array<i64: 1, 8, 16>}]} {
    %c0 = arith.constant 0 : index
    %c0_0 = arith.constant 0 : index
    %c0_1 = arith.constant 0 : index
    %0 = vector.load %arg1[%c0, %c0_0, %c0_1] : memref<1x4x20xf32, #tpu.memory_space<vmem>>, vector<1x4x20xf32>
    %1 = vector.shape_cast %0 : vector<1x4x20xf32> to vector<4x20xf32>
    %cst = arith.constant 0.000000e+00 : f32
    %2 = vector.broadcast %cst : f32 to vector<8x16xf32>
    %c0_2 = arith.constant 0 : index
    %c0_3 = arith.constant 0 : index
    %c0_4 = arith.constant 0 : index
    %3 = vector.load %arg2[%c0_2, %c0_3, %c0_4] : memref<5x8x4xf32, #tpu.memory_space<vmem>>, vector<1x8x4xf32>
    %4 = vector.shape_cast %3 : vector<1x8x4xf32> to vector<8x4xf32>
    %5 = vector.extract_strided_slice %1 {offsets = [0, 0], sizes = [4, 16], strides = [1, 1]} : vector<4x20xf32> to vector<4x16xf32>
    %cst_5 = arith.constant dense<0.000000e+00> : vector<8x16xf32>
    %6 = tpu.matmul %4, %5, %cst_5 {dimension_numbers = #tpu.dot_dimension_numbers<[1], [0], [0], [1], [0, 0, 1, 1], [], []>} : vector<8x4xf32>, vector<4x16xf32>, vector<8x16xf32> -> vector<8x16xf32>
    %7 = arith.addf %2, %6 : vector<8x16xf32>
    %c1 = arith.constant 1 : index
    %c0_6 = arith.constant 0 : index
    %c0_7 = arith.constant 0 : index
    %8 = vector.load %arg2[%c1, %c0_6, %c0_7] : memref<5x8x4xf32, #tpu.memory_space<vmem>>, vector<1x8x4xf32>
    %9 = vector.shape_cast %8 : vector<1x8x4xf32> to vector<8x4xf32>
    %10 = vector.extract_strided_slice %1 {offsets = [0, 1], sizes = [4, 16], strides = [1, 1]} : vector<4x20xf32> to vector<4x16xf32>
    %cst_8 = arith.constant dense<0.000000e+00> : vector<8x16xf32>
    %11 = tpu.matmul %9, %10, %cst_8 {dimension_numbers = #tpu.dot_dimension_numbers<[1], [0], [0], [1], [0, 0, 1, 1], [], []>} : vector<8x4xf32>, vector<4x16xf32>, vector<8x16xf32> -> vector<8x16xf32>
    %12 = arith.addf %7, %11 : vector<8x16xf32>
    %c2 = arith.constant 2 : index
    %c0_9 = arith.constant 0 : index
    %c0_10 = arith.constant 0 : index
    %13 = vector.load %arg2[%c2, %c0_9, %c0_10] : memref<5x8x4xf32, #tpu.memory_space<vmem>>, vector<1x8x4xf32>
    %14 = vector.shape_cast %13 : vector<1x8x4xf32> to vector<8x4xf32>
    %15 = vector.extract_strided_slice %1 {offsets = [0, 2], sizes = [4, 16], strides = [1, 1]} : vector<4x20xf32> to vector<4x16xf32>
    %cst_11 = arith.constant dense<0.000000e+00> : vector<8x16xf32>
    %16 = tpu.matmul %14, %15, %cst_11 {dimension_numbers = #tpu.dot_dimension_numbers<[1], [0], [0], [1], [0, 0, 1, 1], [], []>} : vector<8x4xf32>, vector<4x16xf32>, vector<8x16xf32> -> vector<8x16xf32>
    %17 = arith.addf %12, %16 : vector<8x16xf32>
    %c3 = arith.constant 3 : index
    %c0_12 = arith.constant 0 : index
    %c0_13 = arith.constant 0 : index
    %18 = vector.load %arg2[%c3, %c0_12, %c0_13] : memref<5x8x4xf32, #tpu.memory_space<vmem>>, vector<1x8x4xf32>
    %19 = vector.shape_cast %18 : vector<1x8x4xf32> to vector<8x4xf32>
    %20 = vector.extract_strided_slice %1 {offsets = [0, 3], sizes = [4, 16], strides = [1, 1]} : vector<4x20xf32> to vector<4x16xf32>
    %cst_14 = arith.constant dense<0.000000e+00> : vector<8x16xf32>
    %21 = tpu.matmul %19, %20, %cst_14 {dimension_numbers = #tpu.dot_dimension_numbers<[1], [0], [0], [1], [0, 0, 1, 1], [], []>} : vector<8x4xf32>, vector<4x16xf32>, vector<8x16xf32> -> vector<8x16xf32>
    %22 = arith.addf %17, %21 : vector<8x16xf32>
    %c4 = arith.constant 4 : index
    %c0_15 = arith.constant 0 : index
    %c0_16 = arith.constant 0 : index
    %23 = vector.load %arg2[%c4, %c0_15, %c0_16] : memref<5x8x4xf32, #tpu.memory_space<vmem>>, vector<1x8x4xf32>
    %24 = vector.shape_cast %23 : vector<1x8x4xf32> to vector<8x4xf32>
    %25 = vector.extract_strided_slice %1 {offsets = [0, 4], sizes = [4, 16], strides = [1, 1]} : vector<4x20xf32> to vector<4x16xf32>
    %cst_17 = arith.constant dense<0.000000e+00> : vector<8x16xf32>
    %26 = tpu.matmul %24, %25, %cst_17 {dimension_numbers = #tpu.dot_dimension_numbers<[1], [0], [0], [1], [0, 0, 1, 1], [], []>} : vector<8x4xf32>, vector<4x16xf32>, vector<8x16xf32> -> vector<8x16xf32>
    %27 = arith.addf %22, %26 : vector<8x16xf32>
    %c0_18 = arith.constant 0 : index
    %c0_19 = arith.constant 0 : index
    %28 = vector.load %arg3[%c0_18, %c0_19] : memref<8x1xf32, #tpu.memory_space<vmem>>, vector<8x1xf32>
    %29 = vector.broadcast %28 : vector<8x1xf32> to vector<8x16xf32>
    %30 = arith.addf %27, %29 : vector<8x16xf32>
    %cst_20 = arith.constant 0.000000e+00 : f32
    %31 = vector.broadcast %cst_20 : f32 to vector<8x16xf32>
    %32 = arith.maximumf %30, %31 : vector<8x16xf32>
    %cst_21 = arith.constant 0.000000e+00 : f32
    %33 = vector.broadcast %cst_21 : f32 to vector<8x4xf32>
    %c0_22 = arith.constant 0 : index
    %c0_23 = arith.constant 0 : index
    %34 = vector.load %arg9[%c0_22, %c0_23] : memref<8x20xf32, #tpu.memory_space<vmem>>, vector<8x4xf32>
    tpu.vector_store %arg9[%c0_22, %c0_23], %33 {strides = array<i32>} : memref<8x20xf32, #tpu.memory_space<vmem>>, vector<8x4xf32>,
    %c0_24 = arith.constant 0 : index
    %c4_25 = arith.constant 4 : index
    %35 = vector.load %arg9[%c0_24, %c4_25] : memref<8x20xf32, #tpu.memory_space<vmem>>, vector<8x16xf32>
    tpu.vector_store %arg9[%c0_24, %c4_25], %32 {strides = array<i32>} : memref<8x20xf32, #tpu.memory_space<vmem>>, vector<8x16xf32>,
    %cst_26 = arith.constant 0.000000e+00 : f32
    %36 = vector.broadcast %cst_26 : f32 to vector<8x16xf32>
    %c0_27 = arith.constant 0 : index
    %c0_28 = arith.constant 0 : index
    %c0_29 = arith.constant 0 : index
    %37 = vector.load %arg4[%c0_27, %c0_28, %c0_29] : memref<5x8x8xf32, #tpu.memory_space<vmem>>, vector<1x8x8xf32>
    %38 = vector.shape_cast %37 : vector<1x8x8xf32> to vector<8x8xf32>
    %c0_30 = arith.constant 0 : index
    %c0_31 = arith.constant 0 : index
    %39 = vector.load %arg9[%c0_30, %c0_31] : memref<8x20xf32, #tpu.memory_space<vmem>>, vector<8x16xf32>
    %cst_32 = arith.constant dense<0.000000e+00> : vector<8x16xf32>
    %40 = tpu.matmul %38, %39, %cst_32 {dimension_numbers = #tpu.dot_dimension_numbers<[1], [0], [0], [1], [0, 0, 1, 1], [], []>} : vector<8x8xf32>, vector<8x16xf32>, vector<8x16xf32> -> vector<8x16xf32>
    %41 = arith.addf %36, %40 : vector<8x16xf32>
    %c1_33 = arith.constant 1 : index
    %c0_34 = arith.constant 0 : index
    %c0_35 = arith.constant 0 : index
    %42 = vector.load %arg4[%c1_33, %c0_34, %c0_35] : memref<5x8x8xf32, #tpu.memory_space<vmem>>, vector<1x8x8xf32>
    %43 = vector.shape_cast %42 : vector<1x8x8xf32> to vector<8x8xf32>
    %c0_36 = arith.constant 0 : index
    %c1_37 = arith.constant 1 : index
    %44 = vector.load %arg9[%c0_36, %c1_37] : memref<8x20xf32, #tpu.memory_space<vmem>>, vector<8x16xf32>
    %cst_38 = arith.constant dense<0.000000e+00> : vector<8x16xf32>
    %45 = tpu.matmul %43, %44, %cst_38 {dimension_numbers = #tpu.dot_dimension_numbers<[1], [0], [0], [1], [0, 0, 1, 1], [], []>} : vector<8x8xf32>, vector<8x16xf32>, vector<8x16xf32> -> vector<8x16xf32>
    %46 = arith.addf %41, %45 : vector<8x16xf32>
    %c2_39 = arith.constant 2 : index
    %c0_40 = arith.constant 0 : index
    %c0_41 = arith.constant 0 : index
    %47 = vector.load %arg4[%c2_39, %c0_40, %c0_41] : memref<5x8x8xf32, #tpu.memory_space<vmem>>, vector<1x8x8xf32>
    %48 = vector.shape_cast %47 : vector<1x8x8xf32> to vector<8x8xf32>
    %c0_42 = arith.constant 0 : index
    %c2_43 = arith.constant 2 : index
    %49 = vector.load %arg9[%c0_42, %c2_43] : memref<8x20xf32, #tpu.memory_space<vmem>>, vector<8x16xf32>
    %cst_44 = arith.constant dense<0.000000e+00> : vector<8x16xf32>
    %50 = tpu.matmul %48, %49, %cst_44 {dimension_numbers = #tpu.dot_dimension_numbers<[1], [0], [0], [1], [0, 0, 1, 1], [], []>} : vector<8x8xf32>, vector<8x16xf32>, vector<8x16xf32> -> vector<8x16xf32>
    %51 = arith.addf %46, %50 : vector<8x16xf32>
    %c3_45 = arith.constant 3 : index
    %c0_46 = arith.constant 0 : index
    %c0_47 = arith.constant 0 : index
    %52 = vector.load %arg4[%c3_45, %c0_46, %c0_47] : memref<5x8x8xf32, #tpu.memory_space<vmem>>, vector<1x8x8xf32>
    %53 = vector.shape_cast %52 : vector<1x8x8xf32> to vector<8x8xf32>
    %c0_48 = arith.constant 0 : index
    %c3_49 = arith.constant 3 : index
    %54 = vector.load %arg9[%c0_48, %c3_49] : memref<8x20xf32, #tpu.memory_space<vmem>>, vector<8x16xf32>
    %cst_50 = arith.constant dense<0.000000e+00> : vector<8x16xf32>
    %55 = tpu.matmul %53, %54, %cst_50 {dimension_numbers = #tpu.dot_dimension_numbers<[1], [0], [0], [1], [0, 0, 1, 1], [], []>} : vector<8x8xf32>, vector<8x16xf32>, vector<8x16xf32> -> vector<8x16xf32>
    %56 = arith.addf %51, %55 : vector<8x16xf32>
    %c4_51 = arith.constant 4 : index
    %c0_52 = arith.constant 0 : index
    %c0_53 = arith.constant 0 : index
    %57 = vector.load %arg4[%c4_51, %c0_52, %c0_53] : memref<5x8x8xf32, #tpu.memory_space<vmem>>, vector<1x8x8xf32>
    %58 = vector.shape_cast %57 : vector<1x8x8xf32> to vector<8x8xf32>
    %c0_54 = arith.constant 0 : index
    %c4_55 = arith.constant 4 : index
    %59 = vector.load %arg9[%c0_54, %c4_55] : memref<8x20xf32, #tpu.memory_space<vmem>>, vector<8x16xf32>
    %cst_56 = arith.constant dense<0.000000e+00> : vector<8x16xf32>
    %60 = tpu.matmul %58, %59, %cst_56 {dimension_numbers = #tpu.dot_dimension_numbers<[1], [0], [0], [1], [0, 0, 1, 1], [], []>} : vector<8x8xf32>, vector<8x16xf32>, vector<8x16xf32> -> vector<8x16xf32>
    %61 = arith.addf %56, %60 : vector<8x16xf32>
    %c0_57 = arith.constant 0 : index
    %c0_58 = arith.constant 0 : index
    %62 = vector.load %arg5[%c0_57, %c0_58] : memref<8x1xf32, #tpu.memory_space<vmem>>, vector<8x1xf32>
    %63 = vector.broadcast %62 : vector<8x1xf32> to vector<8x16xf32>
    %64 = arith.addf %61, %63 : vector<8x16xf32>
    %cst_59 = arith.constant 0.000000e+00 : f32
    %65 = vector.broadcast %cst_59 : f32 to vector<8x16xf32>
    %66 = arith.maximumf %64, %65 : vector<8x16xf32>
    %67 = vector.extract_strided_slice %1 {offsets = [0, 4], sizes = [4, 16], strides = [1, 1]} : vector<4x20xf32> to vector<4x16xf32>
    %c0_60 = arith.constant 0 : index
    %c0_61 = arith.constant 0 : index
    %68 = vector.load %arg6[%c0_60, %c0_61] : memref<8x4xf32, #tpu.memory_space<vmem>>, vector<8x4xf32>
    %cst_62 = arith.constant dense<0.000000e+00> : vector<8x16xf32>
    %69 = tpu.matmul %68, %67, %cst_62 {dimension_numbers = #tpu.dot_dimension_numbers<[1], [0], [0], [1], [0, 0, 1, 1], [], []>} : vector<8x4xf32>, vector<4x16xf32>, vector<8x16xf32> -> vector<8x16xf32>
    %c0_63 = arith.constant 0 : index
    %c0_64 = arith.constant 0 : index
    %70 = vector.load %arg7[%c0_63, %c0_64] : memref<8x1xf32, #tpu.memory_space<vmem>>, vector<8x1xf32>
    %71 = vector.broadcast %70 : vector<8x1xf32> to vector<8x16xf32>
    %72 = arith.addf %69, %71 : vector<8x16xf32>
    %73 = arith.addf %66, %72 : vector<8x16xf32>
    %cst_65 = arith.constant 0.000000e+00 : f32
    %74 = vector.broadcast %cst_65 : f32 to vector<8x16xf32>
    %75 = arith.maximumf %73, %74 : vector<8x16xf32>
    %c0_66 = arith.constant 0 : index
    %c0_67 = arith.constant 0 : index
    %c0_68 = arith.constant 0 : index
    %76 = vector.load %arg8[%c0_66, %c0_67, %c0_68] : memref<1x8x16xf32, #tpu.memory_space<vmem>>, vector<1x8x16xf32>
    %77 = vector.shape_cast %76 : vector<1x8x16xf32> to vector<8x16xf32>
    %78 = vector.shape_cast %75 : vector<8x16xf32> to vector<1x8x16xf32>
    tpu.vector_store %arg8[%c0_66, %c0_67, %c0_68], %78 {strides = array<i32>} : memref<1x8x16xf32, #tpu.memory_space<vmem>>, vector<1x8x16xf32>,
    return
  }
  func.func @transform_0(%arg0: i32) -> (i32, i32, i32) {
    %c0_i32 = arith.constant 0 : i32
    %c0_i32_0 = arith.constant 0 : i32
    %c0_i32_1 = arith.constant 0 : i32
    return %arg0, %c0_i32, %c0_i32_0 : i32, i32, i32
  }
  func.func @transform_1(%arg0: i32) -> (i32, i32, i32) {
    %c0_i32 = arith.constant 0 : i32
    %c0_i32_0 = arith.constant 0 : i32
    %c0_i32_1 = arith.constant 0 : i32
    %c0_i32_2 = arith.constant 0 : i32
    return %c0_i32, %c0_i32_0, %c0_i32_1 : i32, i32, i32
  }
  func.func @transform_2(%arg0: i32) -> (i32, i32) {
    %c0_i32 = arith.constant 0 : i32
    %c0_i32_0 = arith.constant 0 : i32
    %c0_i32_1 = arith.constant 0 : i32
    return %c0_i32, %c0_i32_0 : i32, i32
  }
  func.func @transform_3(%arg0: i32) -> (i32, i32, i32) {
    %c0_i32 = arith.constant 0 : i32
    %c0_i32_0 = arith.constant 0 : i32
    %c0_i32_1 = arith.constant 0 : i32
    %c0_i32_2 = arith.constant 0 : i32
    return %c0_i32, %c0_i32_0, %c0_i32_1 : i32, i32, i32
  }
  func.func @transform_4(%arg0: i32) -> (i32, i32) {
    %c0_i32 = arith.constant 0 : i32
    %c0_i32_0 = arith.constant 0 : i32
    %c0_i32_1 = arith.constant 0 : i32
    return %c0_i32, %c0_i32_0 : i32, i32
  }
  func.func @transform_5(%arg0: i32) -> (i32, i32) {
    %c0_i32 = arith.constant 0 : i32
    %c0_i32_0 = arith.constant 0 : i32
    %c0_i32_1 = arith.constant 0 : i32
    return %c0_i32, %c0_i32_0 : i32, i32
  }
  func.func @transform_6(%arg0: i32) -> (i32, i32) {
    %c0_i32 = arith.constant 0 : i32
    %c0_i32_0 = arith.constant 0 : i32
    %c0_i32_1 = arith.constant 0 : i32
    return %c0_i32, %c0_i32_0 : i32, i32
  }
  func.func @transform_7(%arg0: i32) -> (i32, i32, i32) {
    %c0_i32 = arith.constant 0 : i32
    %c0_i32_0 = arith.constant 0 : i32
    %c0_i32_1 = arith.constant 0 : i32
    return %arg0, %c0_i32, %c0_i32_0 : i32, i32, i32
  }
}

</mosaic_0001>

<bundles_post_ra>
// kernel: tpu_custom_call.1
= control target key start
LH: loop header
LB: loop body
LE: loop exit
PB: predicated region body
PF: predicated region fallthrough
CT: control target
= control target key end

     0   :  { %12 = vsyncpa [#allocation4], 0  ;;  %s1710_s0 = inlined_call_operand.vmem [shape: f32[2,4,20], index: 0, kind: input, shape index: {}]   ;;  %s1711_s1 = inlined_call_operand.vmem [shape: f32[5,8,4], index: 1, kind: input, shape index: {}]   ;;  %s1712_s2 = inlined_call_operand.vmem [shape: f32[8,1], index: 2, kind: input, shape index: {}]   ;;  %s1713_s3 = inlined_call_operand.vmem [shape: f32[5,8,8], index: 3, kind: input, shape index: {}]   ;;  %s1714_s4 = inlined_call_operand.vmem [shape: f32[8,1], index: 4, kind: input, shape index: {}]   ;;  %s1715_s5 = inlined_call_operand.vmem [shape: f32[8,4], index: 5, kind: input, shape index: {}]   ;;  %s1716_s6 = inlined_call_operand.vmem [shape: f32[8,1], index: 6, kind: input, shape index: {}]   ;;  %s1717_s7 = inlined_call_operand.hbm [shape: f32[2,8,16], index: 7, kind: output, shape index: {}]  }
   0x1   :  { %14 = vsyncpa [#allocation4 + $0x1], 0  ;;  %s1517_s24 = smov 0   ;;  %s1519_s25 = smov 0  }
   0x2   :  { %s1521_s26 = smov 0   ;;  %s1523_s27 = smov 0  }
   0x3 LB: > { %s1538_s28 = sadd.s32 4294967295, %s1466_s27   ;;  %s1245_s29 = sadd.s32 4294967294, %s1466_s27   ;;  %s1466_s27 = sphi %s1523_s27, %s1723_s27   ;;  %s1462_s26 = sphi %s1521_s26, %s1722_s26   ;;  %s1458_s25 = sphi %s1519_s25, %s1721_s25   ;;  %s1454_s24 = sphi %s1517_s24, %s1720_s24  }
   0x4   : > { %s1542_s30 = sadd.s32 1, %s1466_s27   ;;  %s179_s8 = sadd.s32 1, %s1462_s26 }
   0x5   : > { %s176_s9 = ssub.s32 %s1466_s27, %s1542_s30  ;;  %p189_p0 = scmp.ne.s32.totalorder %s1462_s26, %s1458_s25 }
   0x6   : > { %p177_p1 = scmp.eq.s32.totalorder %s176_s9, 0  ;;  %p190_p2 = scmp.eq.s32.totalorder %s1538_s28, 1 }
   0x7   : > { %p195_p3 = scmp.ne.s32.totalorder %s1458_s25, %s1454_s24  ;;  %p196_p4 = scmp.eq.s32.totalorder %s1245_s29, 1 }
   0x8   : > { %s1553_s10 = scalar_select %p177_p1, %s1462_s26, %s179_s8  }
   0x9   : > { %p1555_p5 = por %p190_p2, %p189_p0  ;;  %p1559_p6 = por %p196_p4, %p195_p3 }
   0xa   : > { %p1248_p7 = scmp.ge.s32.totalorder %s1466_s27, 1  ;;  %p239_p8 = scmp.lt.s32.totalorder %s1466_s27, 3 }
   0xc   : > { %p240_p9 = pnand %p1248_p7, %p239_p8 }
   0xd   : > { %p270_p10 = scmp.lt.s32.totalorder (!%p240_p9), %s1538_s28, 1  ;;  %s1471_s20 = smov (!%p240_p9), 127  }
   0xe   : > { %243 = sbr.rel (%p240_p9) target bundleno = 810 (0x32a), region = 48  ;;  %s1472_s21 = smov (!%p240_p9), 125  }
   0xf   : > { %s1473_s22 = smov (!%p240_p9), 126   ;;  %s1474_s23 = smov (!%p240_p9), 124  }
  0x10   : > { %s1475_s29 = smov (!%p240_p9), 4   ;;  %s1277_s15 = sshll.u32 (!%p240_p9), %s1538_s28, 7 }
  0x11   : > { %s1476_s19 = smov (!%p240_p9), [#allocation3]  }
  0x13   : > { %v1468_v0 = vmov 0.0   ;;  %vm281_vm0 = vcmask 31744   ;;  %s271_s13 = scalar_select %p270_p10, %s1538_s28, 1  ;;  %vm1469_vm1 = vmmov 0   ;;  %v1470_v1 = vmov 0   ;;  %v275_v3 = vld [vmem:[%s1711_s1] sm:$0xff] }
  0x14   : > { %1302 = vmatprep.subr.mxu0 %v1468_v0  ;;  %1307 = vmatprep.subr.mxu1 %v1468_v0  ;;  %681 = vst.msk [vmem:[#allocation2] sm:$0xff] %vm281_vm0, %v1468_v0  ;;  %vm285_vm2 = vcmask 1043456   ;;  %v673_v4 = vld [vmem:[%s1712_s2] sm:$0xff]  ;;  %v1251_v5 = vld [vmem:[%s1711_s1 + $0x8] sm:$0xff]  ;;  %v1259_v8 = vld [vmem:[%s1711_s1 + $0x18] sm:$0xff]  ;;  %vm686_vm3 = vcmask 162848  }
  0x15   : > { %1304 = vmatprep.mubr.msk.f32.mxu0 %vm1469_vm1, %v1468_v0  ;;  %1309 = vmatprep.mubr.msk.f32.mxu1 %vm1469_vm1, %v1468_v0  ;;  %s1250_s14 = sshll.u32 %s271_s13, 2  ;;  %v1256_v9 = vld [vmem:[%s1711_s1 + $0x10] sm:$0xff]  ;;  %v1262_v12 = vld [vmem:[%s1711_s1 + $0x20] sm:$0xff]  ;;  %vm696_vm4 = vcmask 64512   ;;  %v1265_v35 = vld [vmem:[%s1713_s3 + $0x8] sm:$0xff]  ;;  %s267_s13 = sand.u32 1, %s1458_s25  }
  0x16   : > { %1404 = vset.pattern.permute.xlu0 %v1470_v1  ;;  %1405 = vset.pattern.permute.xlu1 %v1470_v1  ;;  %s273_s17 = scalar_lea.vmem %s1710_s0, %s1250_s14  ;;  %v688_v32 = vld [vmem:[%s1713_s3] sm:$0xff]  ;;  %v1268_v38 = vld [vmem:[%s1713_s3 + $0x10] sm:$0xff]  ;;  %v1270_v39 = vld [vmem:[%s1713_s3 + $0x18] sm:$0xff]  ;;  %s1249_s14 = sshll.u32 %s267_s13, 3  ;;  %vm1170_vm5 = vcmask 130048  }
  0x17   : > { %v274_v2 = vld [vmem:[%s273_s17] sm:$0xf]  ;;  %s1173_s17 = scalar_lea.sflag [#allocation4], %s267_s13 }
  0x18   : > { %279 = vrot.lane.b32.xlu0 %v274_v2, %s1471_s20  ;;  %515 = vrot.lane.b32.xlu1 %v274_v2, %s1472_s21  ;;  %v1089_v33 = vld [vmem:[%s1716_s6] sm:$0xff] }
  0x19   : > { %1308 = vmatpush3.msk.msra.mxu1 %vm285_vm2, %v274_v2  ;;  %v1080_v34 = vld [vmem:[%s1714_s4] sm:$0xff] }
  0x1a   : > { %1310 = vmatmul.mubr.msk.f32.vlgmr.msra.gmra.mxu1 %vm281_vm0, %v275_v3  ;;  %1317 = vmatprep.subr.mxu1 %v1468_v0  ;;  %v1272_v42 = vld [vmem:[%s1713_s3 + $0x20] sm:$0xff] }
  0x1b   : > { %1319 = vmatprep.mubr.msk.f32.mxu1 %vm1469_vm1, %v1468_v0  ;;  %v1088_v43 = vld [vmem:[%s1715_s5] sm:$0xff] }
  0x1c   : > { %435 = vrot.lane.b32.xlu0 %v274_v2, %s1473_s22  ;;  %595 = vrot.lane.b32.xlu1 %v274_v2, %s1474_s23 }
  0x20   : > { %676 = vperm.xlu0 %1404, %v673_v4  }
  0x8a   : > { %v280_v6 = vpop.permute.xlu0 %279  ;;  %v516_v7 = vpop.permute.xlu1 %515 }
  0x8b   : > { %1303 = vmatpush3.msk.msra.mxu0 %vm285_vm2, %v280_v6  ;;  %1318 = vmatpush3.msk.msra.mxu1 %vm285_vm2, %v516_v7 }
  0x8c   : > { %1305 = vmatmul.mubr.msk.f32.vlgmr.msra.gmra.mxu0 %vm281_vm0, %v1251_v5  ;;  %1312 = vmatprep.subr.mxu0 %v1468_v0 }
  0x8d   : > { %1314 = vmatprep.mubr.msk.f32.mxu0 %vm1469_vm1, %v1468_v0  ;;  %1320 = vmatmul.mubr.msk.f32.vlgmr.msra.gmra.mxu1 %vm281_vm0, %v1259_v8 }
  0x8e   : > { %v436_v10 = vpop.permute.xlu0 %435  ;;  %v1609_v11 = vpop.permute.xlu1 %595  ;;  %1327 = vmatprep.subr.mxu1 %v1468_v0  ;;  %1329 = vmatprep.mubr.msk.f32.mxu1 %vm1469_vm1, %v1468_v0 }
  0x8f   : > { %1313 = vmatpush3.msk.msra.mxu0 %vm285_vm2, %v436_v10 }
  0x90   : > { %1315 = vmatmul.mubr.msk.f32.vlgmr.msra.gmra.mxu0 %vm281_vm0, %v1256_v9  ;;  %1322 = vmatprep.subr.mxu0 %v1468_v0 }
  0x91   : > { %1323 = vmatpush3.msk.msra.mxu0 %vm285_vm2, %v1609_v11  ;;  %1324 = vmatprep.mubr.msk.f32.mxu0 %vm1469_vm1, %v1468_v0 }
  0x92   : > { %1332 = vmatprep.subr.mxu0 %v1468_v0 }
  0x94   : > { %1325 = vmatmul.mubr.msk.f32.vlgmr.msra.gmra.mxu0 %vm281_vm0, %v1262_v12 }
  0x95   : > { %1334 = vmatprep.mubr.msk.f32.mxu0 %vm1469_vm1, %v1468_v0 }
  0x9b   : > { %v677_v25 = vpop.permute.xlu0 %676 }
  0xda   : > { %v429_v13 = vpop.f32.mrf.mxu1 }
  0xdc   : > { %v1311_v14 = vpop.f32.mrf.mxu1 }
 0x14c   : > { %v354_v15 = vpop.f32.mrf.mxu0 }
 0x14d   : > { %v588_v16 = vpop.f32.mrf.mxu1  ;;  %v430_v18 = vadd.f32 %v429_v13, %v354_v15 }
 0x14e   : > { %v1306_v17 = vpop.f32.mrf.mxu0 }
 0x14f   : > { %v1321_v19 = vpop.f32.mrf.mxu1 }
 0x150   : > { %v508_v20 = vpop.f32.mrf.mxu0 }
 0x151   : > { %v512_v21 = vadd.f32 %v508_v20, %v430_v18 }
 0x152   : > { %v1316_v22 = vpop.f32.mrf.mxu0 }
 0x153   : > { %v592_v23 = vadd.f32 %v588_v16, %v512_v21 }
 0x154   : > { %v668_v24 = vpop.f32.mrf.mxu0 }
 0x155   : > { %v672_v26 = vadd.f32 %v668_v24, %v592_v23 }
 0x156   : > { %v1326_v27 = vpop.f32.mrf.mxu0 }
 0x157   : > { %v679_v28 = vadd.f32 %v677_v25, %v672_v26 }
 0x159   : > { %v680_v29 = vmax.f32 %v679_v28, 0.0 }
 0x15b   : > { %683 = vrot.lane.b32.xlu1 %v680_v29, %s1475_s29  ;;  %s1410_s29 = sshll.u32 %s1476_s19, 4  ;;  %s1411_s29 = int_to_ptr.vmem [resolvable:$false] %s1410_s29 }
 0x15c   : > { %s1412_s28 = scalar_lea.vmem %s1411_s29, 256 }
 0x1cd   : > { %v684_v30 = vpop.permute.xlu1 %683 }
 0x1ce   : > { %687 = vst.msk [vmem:[#allocation2] sm:$0xff] %vm686_vm3, %v684_v30 }
 0x1d5   : > { %v689_v31 = vld [vmem:[#allocation2] sm:$0xff] }
 0x1d6   : > { %845 = vrot.lane.b32.xlu0 %v689_v31, %s1473_s22  ;;  %693 = vrot.lane.b32.xlu1 %v689_v31, %s1471_s20  ;;  %s269_s22 = scalar_lea.vmem [#allocation3], %s1249_s14 }
 0x1d7   : > { %1333 = vmatpush3.msra.mxu0 %v689_v31  ;;  %s1186_s20 = sshll.u32 %s269_s22, 4  ;;  %s1187_s20 = int_to_ptr.vmem [resolvable:$true] %s1186_s20 }
 0x1d8   : > { %1335 = vmatmul.mubr.msk.f32.vlgmr.msra.gmra.mxu0 %vm696_vm4, %v688_v32  ;;  %1342 = vmatprep.subr.mxu0 %v1468_v0  ;;  %s1406_s18 = scalar_lea.vmem %s1187_s20, 128  ;;  %p1413_p0 = scmp.lt.s32.totalorder %s1187_s20, %s1411_s29 }
 0x1d9   : > { %1344 = vmatprep.mubr.msk.f32.mxu0 %vm1469_vm1, %v1468_v0  ;;  %p1407_p11 = scmp.ne.s32.totalorder %s1187_s20, %s1406_s18  ;;  %p1414_p1 = scmp.lt.s32.totalorder %s1412_s28, %s1406_s18 }
 0x1da   : > { %1003 = vrot.lane.b32.xlu0 %v689_v31, %s1474_s23  ;;  %924 = vrot.lane.b32.xlu1 %v689_v31, %s1472_s21  ;;  %s1184_s23 = scalar_lea.hbm %s1717_s7, %s1277_s15 }
 0x1db   : > { %p1408_p12 = pnand %p1407_p11, %p1555_p5  ;;  %p1415_p2 = por %p1414_p1, %p1413_p0 }
 0x1dd   : > { %p1409_p13 = pneg %p1408_p12 }
 0x1de   : > { %1092 = vperm.xlu0 %1404, %v1089_v33   ;;  %1083 = vperm.xlu1 %1405, %v1080_v34  }
 0x1df   : > { %p1416_p3 = pnand %p1415_p2, %p1409_p13 }
 0x248   : > { %v846_v36 = vpop.permute.xlu0 %845  ;;  %v694_v37 = vpop.permute.xlu1 %693 }
 0x249   : > { %1328 = vmatpush3.msra.mxu1 %v694_v37 }
 0x24a   : > { %1330 = vmatmul.mubr.msk.f32.vlgmr.msra.gmra.mxu1 %vm696_vm4, %v1265_v35  ;;  %1337 = vmatprep.subr.mxu1 %v1468_v0 }
 0x24b   : > { %1338 = vmatpush3.msra.mxu1 %v846_v36  ;;  %1339 = vmatprep.mubr.msk.f32.mxu1 %vm1469_vm1, %v1468_v0 }
 0x24c   : > { %v1004_v40 = vpop.permute.xlu0 %1003  ;;  %v925_v41 = vpop.permute.xlu1 %924  ;;  %1347 = vmatprep.subr.mxu1 %v1468_v0 }
 0x24d   : > { %1343 = vmatpush3.msra.mxu0 %v925_v41 }
 0x24e   : > { %1340 = vmatmul.mubr.msk.f32.vlgmr.msra.gmra.mxu1 %vm696_vm4, %v1268_v38  ;;  %1345 = vmatmul.mubr.msk.f32.vlgmr.msra.gmra.mxu0 %vm696_vm4, %v1270_v39 }
 0x24f   : > { %1348 = vmatpush3.msra.mxu1 %v1004_v40  ;;  %1352 = vmatprep.subr.mxu0 %v1468_v0 }
 0x250   : > { %1353 = vmatpush3.msk.msra.mxu0 %vm285_vm2, %v1609_v11  ;;  %1349 = vmatprep.mubr.msk.f32.mxu1 %vm1469_vm1, %v1468_v0 }
 0x251   : > { %1354 = vmatprep.mubr.msk.f32.mxu0 %vm1469_vm1, %v1468_v0 }
 0x252   : > { %1350 = vmatmul.mubr.msk.f32.vlgmr.msra.gmra.mxu1 %vm696_vm4, %v1272_v42  ;;  %1355 = vmatmul.mubr.msk.f32.vlgmr.msra.gmra.mxu0 %vm281_vm0, %v1088_v43 }
 0x259   : > { %v1084_v55 = vpop.permute.xlu1 %1083  ;;  %v1093_v62 = vpop.permute.xlu0 %1092 }
 0x298   : > { %v839_v44 = vpop.f32.mrf.mxu0 }
 0x29a   : > { %v1336_v45 = vpop.f32.mrf.mxu0 }
 0x30a   : > { %v766_v46 = vpop.f32.mrf.mxu1 }
 0x30b   : > { %v840_v48 = vadd.f32 %v839_v44, %v766_v46 }
 0x30c   : > { %v1331_v47 = vpop.f32.mrf.mxu1 }
 0x30e   : > { %v917_v49 = vpop.f32.mrf.mxu1  ;;  %v996_v50 = vpop.f32.mrf.mxu0 }
 0x30f   : > { %v921_v51 = vadd.f32 %v917_v49, %v840_v48 }
 0x310   : > { %v1341_v52 = vpop.f32.mrf.mxu1  ;;  %v1346_v53 = vpop.f32.mrf.mxu0 }
 0x311   : > { %v1000_v54 = vadd.f32 %v996_v50, %v921_v51 }
 0x312   : > { %v1075_v56 = vpop.f32.mrf.mxu1  ;;  %v1164_v57 = vpop.f32.mrf.mxu0 }
 0x313   : > { %v1079_v58 = vadd.f32 %v1075_v56, %v1000_v54  ;;  %v1165_v63 = vadd.f32 %v1164_v57, %v1093_v62 }
 0x314   : > { %v1351_v59 = vpop.f32.mrf.mxu1  ;;  %v1356_v60 = vpop.f32.mrf.mxu0 }
 0x315   : > { %v1086_v61 = vadd.f32 %v1084_v55, %v1079_v58 }
 0x317   : > { %v1087_v0 = vmax.f32 %v1086_v61, 0.0 }
 0x319   : > { %v1168_v1 = vadd.f32 %v1165_v63, %v1087_v0 }
 0x31b   : > { %v1169_v2 = vmax.f32 %v1168_v1, 0.0 }
 0x31d   : > { %1171 = vst.msk [vmem:[%s269_s22] sm:$0xff] %vm1170_vm5, %v1169_v2 }
 0x31e   : > { %1419 = shalt.err (!%p1416_p3)
}
 0x31f   : > { %s1420_s8 = scalar_lea.hbm %s1184_s23, 128  ;;  %s1424_s14 = scalar_lea.hbm %s1717_s7, 256 }
 0x320   : > { %p1421_p4 = scmp.ne.s32.totalorder %s1184_s23, %s1420_s8  ;;  %p1425_p9 = scmp.lt.s32.totalorder %s1184_s23, %s1717_s7 }
 0x321   : > { %p1426_p10 = scmp.lt.s32.totalorder %s1424_s14, %s1420_s8 }
 0x322   : > { %p1422_p7 = pnand %p1421_p4, %p1555_p5 }
 0x323   : > { %p1427_p11 = por %p1426_p10, %p1425_p9 }
 0x324   : > { %p1423_p8 = pneg %p1422_p7 }
 0x326   : > { %p1428_p12 = pnand %p1427_p11, %p1423_p8 }
 0x328   : > { %1431 = shalt.err (!%p1428_p12)
}
 0x329   : > { %1357 = dma.vmem_to_hbm [thread:$0]  (%p1555_p5), %s1187_s20, 128, %s1184_s23, %s1173_s17  }
 0x32a PF: > { %p1363_p13 = scmp.ge.s32.totalorder %s1466_s27, 2  ;;  %s1198_s16 = sand.u32 1, %s1454_s24  }
 0x32b   : > { %s1199_s21 = scalar_lea.sflag [#allocation4], %s1198_s16 }
 0x32c   : > { %p1360_p0 = pnand %p1363_p13, %p1559_p6 }
 0x32e   : > { %p1361_p1 = pneg %p1360_p0 }
 0x330   : > { %1449 = dma.done.wait (%p1361_p1), %s1199_s21, 128  }
 0x331   : > { %1451 = vsyncadd (%p1361_p1), %s1199_s21, 4294967168  ;;  %p17_p2 = scmp.ge.s32.totalorder %s1542_s30, 4   ;;  %s1720_s24 = smov %s1458_s25 }
 0x332   : > { %s1721_s25 = smov %s1462_s26  ;;  %s1722_s26 = smov %s1553_s10 }
 0x333   : > { %s1723_s27 = smov %s1542_s30  ;;  %19 = sbr.rel (!%p17_p2) target bundleno = 3 (0x3), region = 91 }
 0x338   :  { %1204 = vsyncpa [#allocation4], 1 }
 0x339   :  { %1206 = vsyncpa [#allocation4 + $0x1], 1 }

</bundles_post_ra>
